<compile_context>
chip_gen: v7x
topology: tpu7x:2x2x1
jax: 0.10.0
libtpu: 0.0.40
codegen_flags: <defaults>
</compile_context>

<pallas_src>
import functools

import jax
import jax.numpy as jnp
from jax import lax
from jax.experimental import pallas as pl
from jax.experimental.pallas import tpu as pltpu

_LANES = 128
_MAX_TM = 8192          # row-tile cap (amortizes per-grid-step overhead)
_F32_TEMPS = 6          # live f32 (TM, C) intermediates inside the kernel


# ---------------------------------------------------------------------------
# In-kernel math
# ---------------------------------------------------------------------------
def _row_loss_col(pred_blk, label_blk, inv_T):
    """Per-row ViLD KD cross-entropy for one (TM, C) tile -> (TM, 1) f32."""
    f32 = jnp.float32
    x = pred_blk.astype(f32) * inv_T
    # softmax(pred / T, axis=-1)
    m = jnp.max(x, axis=-1, keepdims=True)
    e = jnp.exp(x - m)
    p = e * pl.reciprocal(jnp.sum(e, axis=-1, keepdims=True), approx=False)
    # cross_entropy(input=p, target=soft_label) with soft targets:
    #   loss_i = -sum_c t_ic * log_softmax(p)_ic
    #          = log(sum_c exp(p_ic)) * (sum_c t_ic) - sum_c t_ic * p_ic
    # p is in (0, 1], so exp(p) cannot overflow -> no second max pass; this
    # algebraic form also avoids materializing a (TM, C) log_q tile.
    tgt = label_blk.astype(f32)
    logz = jnp.log(jnp.sum(jnp.exp(p), axis=-1, keepdims=True))
    sum_t = jnp.sum(tgt, axis=-1, keepdims=True)
    sum_tp = jnp.sum(tgt * p, axis=-1, keepdims=True)
    return logz * sum_t - sum_tp                                   # (TM, 1)


def _col_to_lane(col):
    """Relayout a (TM, 1) f32 column to a lane-major (1, TM) row.

    Implemented as a K=1 matmul against a ones vector on the (otherwise idle)
    MXU - result[0, j] = col[j, 0] - so no sublane->lane vector reshape is
    needed.  The column is split into a bf16-exact high part plus a small
    residual so the relayout stays accurate even if the MXU runs f32 inputs
    through its fast (bf16) path.
    """
    f32 = jnp.float32
    hi = col.astype(jnp.bfloat16).astype(f32)    # exactly representable in bf16
    lo = col - hi                                # small residual
    ones = jnp.ones((8, 1), f32)
    dims = (((1,), (1,)), ((), ()))              # contract last dim of both
    t_hi = lax.dot_general(ones, hi, dims, preferred_element_type=f32)[0:1, :]
    t_lo = lax.dot_general(ones, lo, dims, preferred_element_type=f32)[0:1, :]
    return t_hi + t_lo                           # (1, TM)


def _row_losses_lane(pred_blk, label_blk, inv_T):
    """Per-row losses of a (TM, C) tile as a lane-major (1, TM) f32 row."""
    return _col_to_lane(_row_loss_col(pred_blk, label_blk, inv_T))


def _vild_ce_rows_kernel(pred_ref, label_ref, out_ref, *, inv_T):
    # reduction='none': lane-dense (1, TM) per-row losses per grid step.
    out_ref[...] = _row_losses_lane(pred_ref[...], label_ref[...], inv_T)


def _vild_ce_sum_kernel(pred_ref, label_ref, w_ref, out_ref, *, inv_T):
    # Fused weighted-sum: one lane-dense (1, 128) partial-sum accumulator per
    # outer ("parallel") grid index, resident across the inner reduction axis.
    @pl.when(pl.program_id(1) == 0)
    def _():
        out_ref[...] = jnp.zeros_like(out_ref)

    wl = _row_losses_lane(pred_ref[...], label_ref[...], inv_T) * w_ref[...]
    out_ref[...] += jnp.sum(wl, keepdims=True)   # (1, 1) broadcast over lanes


# ---------------------------------------------------------------------------
# Tiling / VMEM budgeting (generation aware)
# ---------------------------------------------------------------------------
def _vmem_capacity_bytes():
    try:
        cap = int(pltpu.get_tpu_info().vmem_capacity_bytes)
        if cap > 0:
            return cap
    except Exception:
        pass
    return 128 * 1024 * 1024


def _tile_rows_and_vmem_limit(n_rows, n_cls, itemsize):
    """Pick the row tile TM (multiple of 128) and an explicit VMEM limit."""
    cap = _vmem_capacity_bytes()
    # Inputs are double-buffered by the BlockSpec pipeline; the kernel also
    # materializes ~_F32_TEMPS f32 (TM, C) intermediates.  Budget roughly half
    # of physical VMEM (<= 64 MiB) for that footprint: ~64 MiB on 128-MiB
    # v5e/v6e, ~32 MiB on 64-MiB v7x.
    budget = min(cap // 2, 64 * 1024 * 1024)
    per_row = 2 * 2 * n_cls * itemsize + _F32_TEMPS * 4 * n_cls
    tm = budget // max(per_row, 1)
    tm = min(_MAX_TM, max(_LANES, (tm // _LANES) * _LANES))
    tm = min(tm, max(_LANES, ((n_rows + _LANES - 1) // _LANES) * _LANES))
    # TODO(synk): tile the class axis (two-pass softmax) if even a 128-row
    # full-C tile exceeds VMEM for extremely large class counts.
    footprint = tm * per_row + 4 * 8 * tm * 4    # + small lane-major temps/outs
    vmem_limit = footprint + footprint // 4 + (8 << 20)
    vmem_limit = max(vmem_limit, 32 * 1024 * 1024)
    vmem_limit = min(vmem_limit, cap - (16 << 20), 100 * 1024 * 1024)
    return tm, int(vmem_limit)


def _pad_rows(x, n_pad):
    n = x.shape[0]
    if n_pad == n:
        return x
    return jnp.pad(x, ((0, n_pad - n),) + ((0, 0),) * (x.ndim - 1))


# ---------------------------------------------------------------------------
# pallas_call wrappers
# ---------------------------------------------------------------------------
def vild_ce_per_sample_loss(pred, soft_label, T):
    """Per-sample (reduction='none') KD cross-entropy loss, shape (N,), f32."""
    N, C = pred.shape
    assert soft_label.shape == (N, C)
    itemsize = max(jnp.dtype(pred.dtype).itemsize,
                   jnp.dtype(soft_label.dtype).itemsize)
    TM, vmem_limit = _tile_rows_and_vmem_limit(N, C, itemsize)
    n_tiles = pl.cdiv(N, TM)
    n_pad = n_tiles * TM
    pred_p = _pad_rows(pred, n_pad)
    label_p = _pad_rows(soft_label, n_pad)
    cost = pl.CostEstimate(
        flops=12 * n_pad * C,
        transcendentals=2 * n_pad * C,
        bytes_accessed=2 * n_pad * C * itemsize + n_pad * 4,
    )
    out = pl.pallas_call(
        functools.partial(_vild_ce_rows_kernel, inv_T=1.0 / float(T)),
        out_shape=jax.ShapeDtypeStruct((n_tiles, TM), jnp.float32),
        grid_spec=pltpu.PrefetchScalarGridSpec(
            num_scalar_prefetch=0,
            grid=(n_tiles,),
            in_specs=[pl.BlockSpec((TM, C), lambda i: (i, 0)),
                      pl.BlockSpec((TM, C), lambda i: (i, 0))],
            # Lane-dense output: (1, TM) blocks -> unmasked full-lane stores.
            out_specs=pl.BlockSpec((1, TM), lambda i: (i, 0)),
        ),
        compiler_params=pltpu.CompilerParams(
            dimension_semantics=("parallel",),
            vmem_limit_bytes=vmem_limit),
        cost_estimate=cost,
    )(pred_p, label_p)
    return out.reshape(-1)[:N]


def vild_ce_weighted_sum(pred, soft_label, T, weight=None):
    """Fused sum_i weight_i * kd_loss_i (weight defaults to 1). Scalar f32."""
    N, C = pred.shape
    assert soft_label.shape == (N, C)
    itemsize = max(jnp.dtype(pred.dtype).itemsize,
                   jnp.dtype(soft_label.dtype).itemsize)
    TM, vmem_limit = _tile_rows_and_vmem_limit(N, C, itemsize)
    n_tiles = pl.cdiv(N, TM)
    n_pad = n_tiles * TM
    pred_p = _pad_rows(pred, n_pad)
    label_p = _pad_rows(soft_label, n_pad)

    if weight is None:
        w = jnp.ones((N,), jnp.float32)
    else:
        w = jnp.asarray(weight, jnp.float32).reshape(N)
    # Lane-dense weights; padded rows get zero weight (and zero soft targets).
    w_p = jnp.pad(w, (0, n_pad - N)).reshape(n_tiles, TM)

    # Two-TensorCore split (v7x megacore): one partial-sum accumulator per
    # value of the outer "parallel" axis; harmless on single-TC v5e/v6e.
    split = 2 if (n_tiles >= 2 and n_tiles % 2 == 0) else 1
    tiles_per_split = n_tiles // split

    cost = pl.CostEstimate(
        flops=12 * n_pad * C,
        transcendentals=2 * n_pad * C,
        bytes_accessed=2 * n_pad * C * itemsize + n_pad * 4 + split * 128 * 4,
    )
    partial = pl.pallas_call(
        functools.partial(_vild_ce_sum_kernel, inv_T=1.0 / float(T)),
        out_shape=jax.ShapeDtypeStruct((split, 128), jnp.float32),
        grid_spec=pltpu.PrefetchScalarGridSpec(
            num_scalar_prefetch=0,
            grid=(split, tiles_per_split),
            in_specs=[
                pl.BlockSpec((TM, C), lambda s, t: (s * tiles_per_split + t, 0)),
                pl.BlockSpec((TM, C), lambda s, t: (s * tiles_per_split + t, 0)),
                pl.BlockSpec((1, TM), lambda s, t: (s * tiles_per_split + t, 0)),
            ],
            out_specs=pl.BlockSpec((1, 128), lambda s, t: (s, 0)),
        ),
        compiler_params=pltpu.CompilerParams(
            dimension_semantics=("parallel", "arbitrary"),
            vmem_limit_bytes=vmem_limit),
        cost_estimate=cost,
    )(pred_p, label_p, w_p)
    return jnp.sum(partial[:, 0])


def vild_cross_entropy_loss(pred, soft_label, *, T=100, loss_weight=1.0,
                            reduction='mean', weight=None, avg_factor=None,
                            reduction_override=None):
    """JAX/Pallas equivalent of ViLDCrossEntropyLoss.forward."""
    assert reduction_override in (None, 'none', 'mean', 'sum')
    reduction = reduction_override if reduction_override else reduction
    N = pred.shape[0]

    if reduction == 'none':
        loss = vild_ce_per_sample_loss(pred, soft_label, T)
        if weight is not None:
            loss = loss * jnp.asarray(weight, jnp.float32).reshape(N)
        # avg_factor with reduction='none' leaves the loss unreduced (mmdet).
        return loss_weight * loss

    if avg_factor is not None and reduction == 'sum':
        raise ValueError('avg_factor can not be used with reduction="sum"')

    total = vild_ce_weighted_sum(pred, soft_label, T, weight=weight)
    if reduction == 'sum':
        loss = total
    else:  # 'mean'
        denom = float(N) if avg_factor is None else avg_factor
        loss = total / denom
    return loss_weight * loss


if __name__ == "__main__":
    key = jax.random.PRNGKey(0)
    k1, k2, k3, k4, k5 = jax.random.split(key, 5)

    def reference_per_row(pred, soft_label, T):
        p = jax.nn.softmax(pred.astype(jnp.float32) / T, axis=-1)
        log_q = jax.nn.log_softmax(p, axis=-1)
        return -jnp.sum(soft_label.astype(jnp.float32) * log_q, axis=-1)

    # Tolerances: 1e-4 leaves margin for the MXU-based (TM,1)->(1,TM) relayout
    # rounding while still catching any real (>=1e-3) numerical error.
    RTOL = ATOL = 1e-4

    # Case 1: default 'mean' reduction (pred: (N, n + 1) logits).
    N, C = 8, 32
    pred = jax.random.normal(k1, (N, C), dtype=jnp.float32)
    soft_label = jax.nn.softmax(
        jax.random.normal(k2, (N, C), dtype=jnp.float32), axis=-1)

    loss_mean = vild_cross_entropy_loss(pred, soft_label, T=100,
                                        loss_weight=1.0, reduction='mean')
    loss_mean = jax.block_until_ready(loss_mean)
    ref_mean = jnp.mean(reference_per_row(pred, soft_label, 100.0))
    assert jnp.allclose(loss_mean, ref_mean, rtol=RTOL, atol=ATOL), (loss_mean, ref_mean)

    # Case 2: 'none' reduction (per-sample losses, lane-dense kernel output).
    loss_none = vild_cross_entropy_loss(pred, soft_label, T=100, reduction='none')
    loss_none = jax.block_until_ready(loss_none)
    ref_none = reference_per_row(pred, soft_label, 100.0)
    assert loss_none.shape == (N,)
    assert jnp.allclose(loss_none, ref_none, rtol=RTOL, atol=ATOL), (loss_none, ref_none)

    # Case 2b: 'sum' reduction.
    loss_sum = vild_cross_entropy_loss(pred, soft_label, T=100, reduction='sum')
    loss_sum = jax.block_until_ready(loss_sum)
    ref_sum = jnp.sum(reference_per_row(pred, soft_label, 100.0))
    assert jnp.allclose(loss_sum, ref_sum, rtol=RTOL, atol=ATOL), (loss_sum, ref_sum)

    # Case 3: weighted mean + avg_factor, odd shapes exercising row padding.
    N2, C2 = 10, 33
    pred2 = jax.random.normal(k3, (N2, C2), dtype=jnp.float32)
    soft2 = jax.nn.softmax(
        jax.random.normal(k4, (N2, C2), dtype=jnp.float32), axis=-1)
    w2 = jax.random.uniform(k5, (N2,), dtype=jnp.float32)
    loss_w = vild_cross_entropy_loss(pred2, soft2, T=100, loss_weight=0.5,
                                     reduction='mean', weight=w2, avg_factor=7.0)
    loss_w = jax.block_until_ready(loss_w)
    ref_w = 0.5 * jnp.sum(reference_per_row(pred2, soft2, 100.0) * w2) / 7.0
    assert jnp.allclose(loss_w, ref_w, rtol=RTOL, atol=ATOL), (loss_w, ref_w)

    print("KERNEL_OK")
</pallas_src>

<mosaic_0001>
module attributes {stable_mosaic.version = 11 : i64} {
  func.func @_vild_ce_sum_kernel(%arg0: i32, %arg1: i32, %arg2: memref<128x32xf32, #tpu.memory_space<vmem>>, %arg3: memref<128x32xf32, #tpu.memory_space<vmem>>, %arg4: memref<1x128xf32, #tpu.memory_space<vmem>>, %arg5: memref<1x128xf32, #tpu.memory_space<vmem>>) attributes {dimension_semantics = [#tpu.dimension_semantics<parallel>, #tpu.dimension_semantics<arbitrary>], iteration_bounds = array<i64: 1, 1>, scalar_prefetch = 0 : i64, scratch_operands = 0 : i64, tpu.core_type = #tpu.core_type<tc>, window_params = [{transform_indices = @transform_0, window_bounds = array<i64: 128, 32>}, {transform_indices = @transform_1, window_bounds = array<i64: 128, 32>}, {transform_indices = @transform_2, window_bounds = array<i64: 1, 128>}, {transform_indices = @transform_3, window_bounds = array<i64: 1, 128>}]} {
    %c0_i32 = arith.constant 0 : i32
    %0 = arith.cmpi eq, %arg1, %c0_i32 : i32
    %1 = arith.extui %0 : i1 to i32
    %c0_i32_0 = arith.constant 0 : i32
    %2 = arith.cmpi ne, %1, %c0_i32_0 : i32
    scf.if %2 {
      %cst_19 = arith.constant 0.000000e+00 : f32
      %48 = vector.broadcast %cst_19 : f32 to vector<1x128xf32>
      %c0_20 = arith.constant 0 : index
      %c0_21 = arith.constant 0 : index
      %49 = vector.load %arg5[%c0_20, %c0_21] : memref<1x128xf32, #tpu.memory_space<vmem>>, vector<1x128xf32>
      tpu.vector_store %arg5[%c0_20, %c0_21], %48 {strides = array<i32>} : memref<1x128xf32, #tpu.memory_space<vmem>>, vector<1x128xf32>,
    } else {
    }
    %c0 = arith.constant 0 : index
    %c0_1 = arith.constant 0 : index
    %3 = vector.load %arg2[%c0, %c0_1] : memref<128x32xf32, #tpu.memory_space<vmem>>, vector<128x32xf32>
    %c0_2 = arith.constant 0 : index
    %c0_3 = arith.constant 0 : index
    %4 = vector.load %arg3[%c0_2, %c0_3] : memref<128x32xf32, #tpu.memory_space<vmem>>, vector<128x32xf32>
    %cst = arith.constant 0.00999999977 : f32
    %5 = vector.broadcast %cst : f32 to vector<128x32xf32>
    %6 = arith.mulf %3, %5 : vector<128x32xf32>
    %cst_4 = arith.constant dense<0xFF800000> : vector<128xf32>
    %7 = vector.multi_reduction <maximumf>, %6, %cst_4 [1] : vector<128x32xf32> to vector<128xf32>
    %8 = vector.shape_cast %7 : vector<128xf32> to vector<128x1xf32>
    %9 = vector.broadcast %8 : vector<128x1xf32> to vector<128x32xf32>
    %10 = arith.subf %6, %9 : vector<128x32xf32>
    %11 = math.exp %10 : vector<128x32xf32>
    %cst_5 = arith.constant dense<0.000000e+00> : vector<128xf32>
    %12 = vector.multi_reduction <add>, %11, %cst_5 [1] : vector<128x32xf32> to vector<128xf32>
    %13 = vector.shape_cast %12 : vector<128xf32> to vector<128x1xf32>
    %14 = tpu.reciprocal %13 : vector<128x1xf32> -> vector<128x1xf32>
    %15 = vector.broadcast %14 : vector<128x1xf32> to vector<128x32xf32>
    %16 = arith.mulf %11, %15 : vector<128x32xf32>
    %17 = math.exp %16 : vector<128x32xf32>
    %cst_6 = arith.constant dense<0.000000e+00> : vector<128xf32>
    %18 = vector.multi_reduction <add>, %17, %cst_6 [1] : vector<128x32xf32> to vector<128xf32>
    %19 = vector.shape_cast %18 : vector<128xf32> to vector<128x1xf32>
    %20 = math.log %19 : vector<128x1xf32>
    %cst_7 = arith.constant dense<0.000000e+00> : vector<128xf32>
    %21 = vector.multi_reduction <add>, %4, %cst_7 [1] : vector<128x32xf32> to vector<128xf32>
    %22 = vector.shape_cast %21 : vector<128xf32> to vector<128x1xf32>
    %23 = arith.mulf %4, %16 : vector<128x32xf32>
    %cst_8 = arith.constant dense<0.000000e+00> : vector<128xf32>
    %24 = vector.multi_reduction <add>, %23, %cst_8 [1] : vector<128x32xf32> to vector<128xf32>
    %25 = vector.shape_cast %24 : vector<128xf32> to vector<128x1xf32>
    %26 = arith.mulf %20, %22 : vector<128x1xf32>
    %27 = arith.subf %26, %25 : vector<128x1xf32>
    %28 = arith.truncf %27 : vector<128x1xf32> to vector<128x1xbf16>
    %29 = arith.extf %28 : vector<128x1xbf16> to vector<128x1xf32>
    %30 = arith.subf %27, %29 : vector<128x1xf32>
    %cst_9 = arith.constant 1.000000e+00 : f32
    %31 = vector.broadcast %cst_9 : f32 to vector<8x1xf32>
    %cst_10 = arith.constant dense<0.000000e+00> : vector<8x128xf32>
    %32 = tpu.matmul %31, %29, %cst_10 {dimension_numbers = #tpu.dot_dimension_numbers<[1], [1], [0], [0], [0, 0, 1, 0], [], []>} : vector<8x1xf32>, vector<128x1xf32>, vector<8x128xf32> -> vector<8x128xf32>
    %33 = vector.extract_strided_slice %32 {offsets = [0, 0], sizes = [1, 128], strides = [1, 1]} : vector<8x128xf32> to vector<1x128xf32>
    %cst_11 = arith.constant dense<0.000000e+00> : vector<8x128xf32>
    %34 = tpu.matmul %31, %30, %cst_11 {dimension_numbers = #tpu.dot_dimension_numbers<[1], [1], [0], [0], [0, 0, 1, 0], [], []>} : vector<8x1xf32>, vector<128x1xf32>, vector<8x128xf32> -> vector<8x128xf32>
    %35 = vector.extract_strided_slice %34 {offsets = [0, 0], sizes = [1, 128], strides = [1, 1]} : vector<8x128xf32> to vector<1x128xf32>
    %36 = arith.addf %33, %35 : vector<1x128xf32>
    %c0_12 = arith.constant 0 : index
    %c0_13 = arith.constant 0 : index
    %37 = vector.load %arg4[%c0_12, %c0_13] : memref<1x128xf32, #tpu.memory_space<vmem>>, vector<1x128xf32>
    %38 = arith.mulf %36, %37 : vector<1x128xf32>
    %c0_14 = arith.constant 0 : index
    %c0_15 = arith.constant 0 : index
    %39 = vector.load %arg5[%c0_14, %c0_15] : memref<1x128xf32, #tpu.memory_space<vmem>>, vector<1x128xf32>
    %40 = vector.shape_cast %38 : vector<1x128xf32> to vector<1x1x128xf32>
    %cst_16 = arith.constant dense<0.000000e+00> : vector<1xf32>
    %41 = vector.multi_reduction <add>, %40, %cst_16 [1, 2] : vector<1x1x128xf32> to vector<1xf32>
    %42 = vector.shape_cast %41 : vector<1xf32> to vector<1x1x1xf32>
    %43 = vector.extract %42[0, 0, 0] : f32 from vector<1x1x1xf32>
    %44 = vector.broadcast %43 : f32 to vector<1x1xf32>
    %45 = vector.broadcast %44 : vector<1x1xf32> to vector<1x128xf32>
    %46 = arith.addf %39, %45 : vector<1x128xf32>
    %c0_17 = arith.constant 0 : index
    %c0_18 = arith.constant 0 : index
    %47 = vector.load %arg5[%c0_17, %c0_18] : memref<1x128xf32, #tpu.memory_space<vmem>>, vector<1x128xf32>
    tpu.vector_store %arg5[%c0_17, %c0_18], %46 {strides = array<i32>} : memref<1x128xf32, #tpu.memory_space<vmem>>, vector<1x128xf32>,
    return
  }
  func.func @transform_0(%arg0: i32, %arg1: i32) -> (i32, i32) {
    %c1_i32 = arith.constant 1 : i32
    %0 = arith.muli %arg0, %c1_i32 : i32
    %1 = arith.addi %0, %arg1 : i32
    %c0_i32 = arith.constant 0 : i32
    %c0_i32_0 = arith.constant 0 : i32
    return %1, %c0_i32 : i32, i32
  }
  func.func @transform_1(%arg0: i32, %arg1: i32) -> (i32, i32) {
    %c1_i32 = arith.constant 1 : i32
    %0 = arith.muli %arg0, %c1_i32 : i32
    %1 = arith.addi %0, %arg1 : i32
    %c0_i32 = arith.constant 0 : i32
    %c0_i32_0 = arith.constant 0 : i32
    return %1, %c0_i32 : i32, i32
  }
  func.func @transform_2(%arg0: i32, %arg1: i32) -> (i32, i32) {
    %c1_i32 = arith.constant 1 : i32
    %0 = arith.muli %arg0, %c1_i32 : i32
    %1 = arith.addi %0, %arg1 : i32
    %c0_i32 = arith.constant 0 : i32
    %c0_i32_0 = arith.constant 0 : i32
    return %1, %c0_i32 : i32, i32
  }
  func.func @transform_3(%arg0: i32, %arg1: i32) -> (i32, i32) {
    %c0_i32 = arith.constant 0 : i32
    %c0_i32_0 = arith.constant 0 : i32
    return %arg0, %c0_i32 : i32, i32
  }
}

</mosaic_0001>

<bundles_post_ra>
// kernel: tpu_custom_call.1
= control target key start
LH: loop header
LB: loop body
LE: loop exit
PB: predicated region body
PF: predicated region fallthrough
CT: control target
= control target key end

     0   :  { %vm126_vm0 = vcmask 261120   ;;  %s1698_s0 = inlined_call_operand.vmem [shape: f32[128,32], index: 0, kind: input, shape index: {}]   ;;  %s1699_s1 = inlined_call_operand.vmem [shape: f32[128,32], index: 1, kind: input, shape index: {}]   ;;  %s1700_s2 = inlined_call_operand.vmem [shape: f32[1,128], index: 2, kind: input, shape index: {}]   ;;  %s1701_s3 = inlined_call_operand.hbm [shape: f32[1,128], index: 3, kind: output, shape index: {}]  }
   0x1   :  { %v78_v0 = vld [vmem:[%s1698_s0] sm:$0xff]  ;;  %v80_v1 = vld [vmem:[%s1698_s0 + $0x10] sm:$0xff]  ;;  %v79_v2 = vld [vmem:[%s1698_s0 + $0x8] sm:$0xff] }
   0x2   :  { %v1282_v3 = vmul.f32 0.01, %v78_v0  ;;  %v1284_v4 = vmul.f32 0.01, %v80_v1  ;;  %v1286_v5 = vmul.f32 0.01, %v79_v2 }
   0x3   :  { %v81_v6 = vld [vmem:[%s1698_s0 + $0x18] sm:$0xff]  ;;  %v82_v7 = vld [vmem:[%s1698_s0 + $0x20] sm:$0xff]  ;;  %v83_v8 = vld [vmem:[%s1698_s0 + $0x28] sm:$0xff] }
   0x4   :  { %v127_v9 = vsel %vm126_vm0, %v1282_v3, -inf  ;;  %v133_v10 = vsel %vm126_vm0, %v1284_v4, -inf  ;;  %v1301_v11 = vmul.f32 0.01, %v81_v6  ;;  %v130_v12 = vsel %vm126_vm0, %v1286_v5, -inf  ;;  %v84_v16 = vld [vmem:[%s1698_s0 + $0x30] sm:$0xff] }
   0x5   :  { %128 = vmax.xlane.f32.xlu0 %v127_v9  ;;  %134 = vmax.xlane.f32.xlu1 %v133_v10  ;;  %v1307_v14 = vmul.f32 0.01, %v82_v7  ;;  %v1309_v15 = vmul.f32 0.01, %v83_v8  ;;  %v85_v17 = vld [vmem:[%s1698_s0 + $0x38] sm:$0xff]  ;;  %v86_v22 = vld [vmem:[%s1698_s0 + $0x40] sm:$0xff] }
   0x6   :  { %v136_v13 = vsel %vm126_vm0, %v1301_v11, -inf  ;;  %v1321_v20 = vmul.f32 0.01, %v84_v16  ;;  %v1323_v21 = vmul.f32 0.01, %v85_v17  ;;  %v87_v23 = vld [vmem:[%s1698_s0 + $0x48] sm:$0xff] }
   0x7   :  { %v139_v18 = vsel %vm126_vm0, %v1307_v14, -inf  ;;  %v142_v19 = vsel %vm126_vm0, %v1309_v15, -inf }
   0x9   :  { %131 = vmax.xlane.f32.xlu0 %v130_v12  ;;  %137 = vmax.xlane.f32.xlu1 %v136_v13 }
   0xa   :  { %8 = vsyncpa [#allocation3], 0  ;;  %v145_v24 = vsel %vm126_vm0, %v1321_v20, -inf  ;;  %v148_v25 = vsel %vm126_vm0, %v1323_v21, -inf  ;;  %v1335_v26 = vmul.f32 0.01, %v86_v22 }
   0xb   :  { %v1337_v27 = vmul.f32 0.01, %v87_v23  ;;  %v88_v28 = vld [vmem:[%s1698_s0 + $0x50] sm:$0xff]  ;;  %v89_v29 = vld [vmem:[%s1698_s0 + $0x58] sm:$0xff]  ;;  %v90_v34 = vld [vmem:[%s1698_s0 + $0x60] sm:$0xff]  ;;  %vm1250_vm1 = vmmov 0  }
   0xc   :  { %v151_v30 = vsel %vm126_vm0, %v1335_v26, -inf  ;;  %v1349_v32 = vmul.f32 0.01, %v88_v28  ;;  %v1351_v33 = vmul.f32 0.01, %v89_v29  ;;  %v91_v35 = vld [vmem:[%s1698_s0 + $0x68] sm:$0xff] }
   0xd   :  { %140 = vmax.xlane.f32.xlu0 %v139_v18  ;;  %143 = vmax.xlane.f32.xlu1 %v142_v19  ;;  %v154_v31 = vsel %vm126_vm0, %v1337_v27, -inf  ;;  %v1363_v38 = vmul.f32 0.01, %v90_v34  ;;  %v1365_v39 = vmul.f32 0.01, %v91_v35  ;;  %v92_v40 = vld [vmem:[%s1698_s0 + $0x70] sm:$0xff] }
   0xe   :  { %v157_v36 = vsel %vm126_vm0, %v1349_v32, -inf  ;;  %v160_v37 = vsel %vm126_vm0, %v1351_v33, -inf  ;;  %v93_v41 = vld [vmem:[%s1698_s0 + $0x78] sm:$0xff]  ;;  %v1377_v44 = vmul.f32 0.01, %v92_v40  ;;  %vm599_vm2 = vcmask 7168  }
   0xf   :  { %v163_v42 = vsel %vm126_vm0, %v1363_v38, -inf  ;;  %v166_v43 = vsel %vm126_vm0, %v1365_v39, -inf  ;;  %v1379_v45 = vmul.f32 0.01, %v93_v41  ;;  %vm1625_vm3 = vmpackc.low %vm599_vm2, %vm599_vm2  ;;  %vm843_vm4 = vcmask 1040384   ;;  %s1252_s21 = smov [#allocation2]  }
  0x10   :  { %v169_v46 = vsel %vm126_vm0, %v1377_v44, -inf  ;;  %s863_s22 = sshll.u32 %s1252_s21, 4  ;;  %s864_s22 = int_to_ptr.vmem [resolvable:$true] %s863_s22 }
  0x11   :  { %146 = vmax.xlane.f32.xlu0 %v145_v24  ;;  %149 = vmax.xlane.f32.xlu1 %v148_v25  ;;  %v172_v47 = vsel %vm126_vm0, %v1379_v45, -inf  ;;  %s1228_s24 = scalar_lea.vmem %s864_s22, 32  ;;  %p1229_p1 = scmp.lt.s32.totalorder %s864_s22, %s864_s22 }
  0x15   :  { %152 = vmax.xlane.f32.xlu0 %v151_v30  ;;  %155 = vmax.xlane.f32.xlu1 %v154_v31 }
  0x19   :  { %158 = vmax.xlane.f32.xlu0 %v157_v36  ;;  %161 = vmax.xlane.f32.xlu1 %v160_v37 }
  0x1d   :  { %164 = vmax.xlane.f32.xlu0 %v163_v42  ;;  %167 = vmax.xlane.f32.xlu1 %v166_v43 }
  0x21   :  { %170 = vmax.xlane.f32.xlu0 %v169_v46  ;;  %173 = vmax.xlane.f32.xlu1 %v172_v47 }
  0x92   :  { %v129_v48 = vpop.xlane.xlu0 %128  ;;  %v135_v49 = vpop.xlane.xlu1 %134 }
  0x93   :  { %v175_v50 = vsub.f32 %v1282_v3, %v129_v48  ;;  %v177_v51 = vsub.f32 %v1284_v4, %v135_v49 }
  0x95   :  { %v191_v52 = vmul.f32 1.442695, %v175_v50  ;;  %v195_v53 = vmul.f32 1.442695, %v177_v51 }
  0x96   :  { %v132_v54 = vpop.xlane.xlu0 %131  ;;  %v138_v55 = vpop.xlane.xlu1 %137 }
  0x97   :  { %1096 = vpow2.f32 %v191_v52  ;;  %v176_v56 = vsub.f32 %v1286_v5, %v132_v54  ;;  %v178_v57 = vsub.f32 %v1301_v11, %v138_v55 }
  0x98   :  { %1098 = vpow2.f32 %v195_v53 }
  0x99   :  { %v193_v58 = vmul.f32 1.442695, %v176_v56  ;;  %v197_v59 = vmul.f32 1.442695, %v178_v57 }
  0x9a   :  { %v141_v60 = vpop.xlane.xlu0 %140  ;;  %v144_v61 = vpop.xlane.xlu1 %143 }
  0x9b   :  { %1100 = vpow2.f32 %v193_v58  ;;  %v179_v62 = vsub.f32 %v1307_v14, %v141_v60  ;;  %v180_v63 = vsub.f32 %v1309_v15, %v144_v61  ;;  %v94_v61 = vld [vmem:[%s1699_s1] sm:$0xff] }
  0x9c   :  { %1102 = vpow2.f32 %v197_v59 }
  0x9d   :  { %v199_v0 = vmul.f32 1.442695, %v179_v62  ;;  %v201_v1 = vmul.f32 1.442695, %v180_v63 }
  0x9e   :  { %v147_v2 = vpop.xlane.xlu0 %146  ;;  %v150_v3 = vpop.xlane.xlu1 %149 }
  0x9f   :  { %1104 = vpow2.f32 %v199_v0  ;;  %v181_v4 = vsub.f32 %v1321_v20, %v147_v2  ;;  %v182_v5 = vsub.f32 %v1323_v21, %v150_v3  ;;  %v95_v2 = vld [vmem:[%s1699_s1 + $0x8] sm:$0xff]  ;;  %v96_v3 = vld [vmem:[%s1699_s1 + $0x10] sm:$0xff] }
  0xa0   :  { %1106 = vpow2.f32 %v201_v1  ;;  %v415_v1 = vsel %vm126_vm0, %v94_v61, 0.0 }
  0xa1   :  { %v1393_v6 = vpop.eup %1096  ;;  %v203_v7 = vmul.f32 1.442695, %v181_v4  ;;  %v205_v8 = vmul.f32 1.442695, %v182_v5  ;;  %v418_v4 = vsel %vm126_vm0, %v95_v2, 0.0  ;;  %v421_v5 = vsel %vm126_vm0, %v96_v3, 0.0 }
  0xa2   :  { %v1395_v9 = vpop.eup %1098  ;;  %v153_v10 = vpop.xlane.xlu0 %152  ;;  %v223_v11 = vsel %vm126_vm0, %v1393_v6, 0.0 }
  0xa3   :  { %v156_v12 = vpop.xlane.xlu1 %155  ;;  %1108 = vpow2.f32 %v203_v7  ;;  %v183_v13 = vsub.f32 %v1335_v26, %v153_v10  ;;  %224 = vadd.xlane.f32.xlu0 %v223_v11  ;;  %v229_v15 = vsel %vm126_vm0, %v1395_v9, 0.0  ;;  %v97_v7 = vld [vmem:[%s1699_s1 + $0x18] sm:$0xff] }
  0xa4   :  { %v184_v14 = vsub.f32 %v1337_v27, %v156_v12  ;;  %1110 = vpow2.f32 %v205_v8  ;;  %v1483_v8 = vld [vmem:[%s1699_s1 + $0x20] sm:$0xff]  ;;  %v424_v10 = vsel %vm126_vm0, %v97_v7, 0.0  ;;  %v1491_v12 = vld [vmem:[%s1699_s1 + $0x28] sm:$0xff] }
  0xa5   :  { %v1403_v16 = vpop.eup %1100  ;;  %v207_v17 = vmul.f32 1.442695, %v183_v13  ;;  %v427_v11 = vsel %vm126_vm0, %v1483_v8, 0.0  ;;  %v430_v13 = vsel %vm126_vm0, %v1491_v12, 0.0 }
  0xa6   :  { %v209_v18 = vmul.f32 1.442695, %v184_v14  ;;  %v1405_v19 = vpop.eup %1102  ;;  %v159_v20 = vpop.xlane.xlu0 %158  ;;  %v226_v21 = vsel %vm126_vm0, %v1403_v16, 0.0 }
  0xa7   :  { %v162_v22 = vpop.xlane.xlu1 %161  ;;  %1112 = vpow2.f32 %v207_v17  ;;  %v185_v23 = vsub.f32 %v1349_v32, %v159_v20  ;;  %230 = vadd.xlane.f32.xlu0 %v229_v15  ;;  %227 = vadd.xlane.f32.xlu1 %v226_v21  ;;  %v232_v25 = vsel %vm126_vm0, %v1405_v19, 0.0 }
  0xa8   :  { %v186_v24 = vsub.f32 %v1351_v33, %v162_v22  ;;  %1114 = vpow2.f32 %v209_v18 }
  0xa9   :  { %v1413_v26 = vpop.eup %1104  ;;  %v211_v27 = vmul.f32 1.442695, %v185_v23 }
  0xaa   :  { %v213_v28 = vmul.f32 1.442695, %v186_v24  ;;  %v1415_v29 = vpop.eup %1106  ;;  %v165_v30 = vpop.xlane.xlu0 %164  ;;  %v235_v31 = vsel %vm126_vm0, %v1413_v26, 0.0 }
  0xab   :  { %v168_v34 = vpop.xlane.xlu1 %167  ;;  %1116 = vpow2.f32 %v211_v27  ;;  %v187_v32 = vsub.f32 %v1363_v38, %v165_v30  ;;  %233 = vadd.xlane.f32.xlu1 %v232_v25  ;;  %236 = vadd.xlane.f32.xlu0 %v235_v31  ;;  %v238_v35 = vsel %vm126_vm0, %v1415_v29, 0.0 }
  0xac   :  { %v188_v33 = vsub.f32 %v1365_v39, %v168_v34  ;;  %1118 = vpow2.f32 %v213_v28 }
  0xad   :  { %v1423_v36 = vpop.eup %1108  ;;  %v215_v37 = vmul.f32 1.442695, %v187_v32 }
  0xae   :  { %v217_v40 = vmul.f32 1.442695, %v188_v33  ;;  %v1425_v41 = vpop.eup %1110  ;;  %v171_v42 = vpop.xlane.xlu0 %170  ;;  %v241_v43 = vsel %vm126_vm0, %v1423_v36, 0.0 }
  0xaf   :  { %v174_v46 = vpop.xlane.xlu1 %173  ;;  %1120 = vpow2.f32 %v215_v37  ;;  %v189_v38 = vsub.f32 %v1377_v44, %v171_v42  ;;  %239 = vadd.xlane.f32.xlu1 %v238_v35  ;;  %242 = vadd.xlane.f32.xlu0 %v241_v43  ;;  %v244_v47 = vsel %vm126_vm0, %v1425_v41, 0.0 }
  0xb0   :  { %v190_v39 = vsub.f32 %v1379_v45, %v174_v46  ;;  %1122 = vpow2.f32 %v217_v40 }
  0xb1   :  { %v1433_v48 = vpop.eup %1112  ;;  %v219_v49 = vmul.f32 1.442695, %v189_v38 }
  0xb2   :  { %v221_v50 = vmul.f32 1.442695, %v190_v39  ;;  %v1435_v51 = vpop.eup %1114  ;;  %v247_v52 = vsel %vm126_vm0, %v1433_v48, 0.0 }
  0xb3   :  { %1124 = vpow2.f32 %v219_v49  ;;  %245 = vadd.xlane.f32.xlu1 %v244_v47  ;;  %248 = vadd.xlane.f32.xlu0 %v247_v52  ;;  %v250_v44 = vsel %vm126_vm0, %v1435_v51, 0.0 }
  0xb4   :  { %1126 = vpow2.f32 %v221_v50 }
  0xb5   :  { %v1441_v45 = vpop.eup %1116 }
  0xb6   :  { %v1443_v53 = vpop.eup %1118  ;;  %v253_v54 = vsel %vm126_vm0, %v1441_v45, 0.0 }
  0xb7   :  { %251 = vadd.xlane.f32.xlu1 %v250_v44  ;;  %254 = vadd.xlane.f32.xlu0 %v253_v54  ;;  %v256_v55 = vsel %vm126_vm0, %v1443_v53, 0.0 }
  0xb9   :  { %v1449_v56 = vpop.eup %1120 }
  0xba   :  { %v1451_v57 = vpop.eup %1122  ;;  %v259_v58 = vsel %vm126_vm0, %v1449_v56, 0.0 }
  0xbb   :  { %257 = vadd.xlane.f32.xlu1 %v256_v55  ;;  %260 = vadd.xlane.f32.xlu0 %v259_v58  ;;  %v262_v59 = vsel %vm126_vm0, %v1451_v57, 0.0 }
  0xbd   :  { %v1457_v60 = vpop.eup %1124 }
  0xbe   :  { %v1462_v62 = vpop.eup %1126  ;;  %v265_v63 = vsel %vm126_vm0, %v1457_v60, 0.0 }
  0xbf   :  { %263 = vadd.xlane.f32.xlu1 %v262_v59  ;;  %266 = vadd.xlane.f32.xlu0 %v265_v63  ;;  %v268_v0 = vsel %vm126_vm0, %v1462_v62, 0.0 }
  0xc3   :  { %269 = vadd.xlane.f32.xlu1 %v268_v0  ;;  %416 = vadd.xlane.f32.xlu0 %v415_v1 }
  0xc7   :  { %419 = vadd.xlane.f32.xlu1 %v418_v4  ;;  %422 = vadd.xlane.f32.xlu0 %v421_v5 }
  0xcb   :  { %425 = vadd.xlane.f32.xlu1 %v424_v10  ;;  %428 = vadd.xlane.f32.xlu0 %v427_v11 }
  0xcf   :  { %431 = vadd.xlane.f32.xlu1 %v430_v13 }
 0x130   :  { %v225_v14 = vpop.xlane.xlu0 %224 }
 0x131   :  { %1128 = vrcp.f32 %v225_v14 }
 0x134   :  { %v228_v15 = vpop.xlane.xlu1 %227  ;;  %v231_v17 = vpop.xlane.xlu0 %230 }
 0x135   :  { %1130 = vrcp.f32 %v228_v15 }
 0x136   :  { %1132 = vrcp.f32 %v231_v17 }
 0x138   :  { %v234_v18 = vpop.xlane.xlu1 %233  ;;  %v237_v20 = vpop.xlane.xlu0 %236 }
 0x139   :  { %1134 = vrcp.f32 %v234_v18 }
 0x13a   :  { %1136 = vrcp.f32 %v237_v20 }
 0x13b   :  { %v1129_v21 = vpop.eup %1128 }
 0x13c   :  { %v240_v22 = vpop.xlane.xlu1 %239  ;;  %v287_v23 = vmul.f32 %v1129_v21, %v1393_v6  ;;  %v243_v24 = vpop.xlane.xlu0 %242 }
 0x13d   :  { %1138 = vrcp.f32 %v240_v22 }
 0x13e   :  { %v463_v25 = vmul.f32 %v287_v23, %v94_v61  ;;  %v303_v27 = vmul.f32 1.442695, %v287_v23  ;;  %v101_v23 = vld [vmem:[%s1699_s1 + $0x38] sm:$0xff] }
 0x13f   :  { %v1131_v28 = vpop.eup %1130 }
 0x140   :  { %v1133_v30 = vpop.eup %1132  ;;  %v479_v31 = vsel %vm126_vm0, %v463_v25, 0.0  ;;  %1140 = vpow2.f32 %v303_v27  ;;  %v288_v34 = vmul.f32 %v1131_v28, %v1403_v16  ;;  %v246_v33 = vpop.xlane.xlu1 %245 }
 0x141   :  { %1142 = vrcp.f32 %v243_v24  ;;  %480 = vadd.xlane.f32.xlu0 %v479_v31  ;;  %v289_v32 = vmul.f32 %v1133_v30, %v1395_v9  ;;  %v249_v39 = vpop.xlane.xlu0 %248  ;;  %v436_v24 = vsel %vm126_vm0, %v101_v23, 0.0 }
 0x142   :  { %v464_v35 = vmul.f32 %v288_v34, %v95_v2  ;;  %v305_v37 = vmul.f32 1.442695, %v288_v34 }
 0x143   :  { %v1135_v40 = vpop.eup %1134  ;;  %v465_v6 = vmul.f32 %v289_v32, %v96_v3  ;;  %v307_v42 = vmul.f32 1.442695, %v289_v32 }
 0x144   :  { %v1137_v43 = vpop.eup %1136  ;;  %v482_v46 = vsel %vm126_vm0, %v464_v35, 0.0  ;;  %1144 = vpow2.f32 %v305_v37  ;;  %v290_v38 = vmul.f32 %v1135_v40, %v1405_v19  ;;  %v252_v54 = vpop.xlane.xlu1 %251 }
 0x145   :  { %1146 = vrcp.f32 %v246_v33  ;;  %483 = vadd.xlane.f32.xlu1 %v482_v46  ;;  %v485_v16 = vsel %vm126_vm0, %v465_v6, 0.0  ;;  %v291_v49 = vmul.f32 %v1137_v43, %v1413_v26  ;;  %v255_v63 = vpop.xlane.xlu0 %254 }
 0x146   :  { %486 = vadd.xlane.f32.xlu0 %v485_v16  ;;  %v466_v47 = vmul.f32 %v290_v38, %v97_v7  ;;  %v309_v9 = vmul.f32 1.442695, %v290_v38  ;;  %1148 = vpow2.f32 %v307_v42 }
 0x147   :  { %v1139_v50 = vpop.eup %1138  ;;  %1150 = vrcp.f32 %v249_v39  ;;  %v311_v19 = vmul.f32 1.442695, %v291_v49  ;;  %v467_v61 = vmul.f32 %v291_v49, %v1483_v8 }
 0x148   :  { %v488_v52 = vsel %vm126_vm0, %v466_v47, 0.0  ;;  %1152 = vpow2.f32 %v309_v9  ;;  %v292_v55 = vmul.f32 %v1139_v50, %v1415_v29  ;;  %v258_v7 = vpop.xlane.xlu1 %257  ;;  %v102_v9 = vld [vmem:[%s1699_s1 + $0x40] sm:$0xff] }
 0x149   :  { %489 = vadd.xlane.f32.xlu1 %v488_v52  ;;  %1154 = vrcp.f32 %v252_v54  ;;  %v491_v4 = vsel %vm126_vm0, %v467_v61, 0.0  ;;  %v261_v18 = vpop.xlane.xlu0 %260 }
 0x14a   :  { %v1141_v44 = vpop.eup %1140  ;;  %1156 = vpow2.f32 %v311_v19  ;;  %v313_v0 = vmul.f32 1.442695, %v292_v55  ;;  %v468_v29 = vmul.f32 %v292_v55, %v1491_v12  ;;  %v100_v12 = vld [vmem:[%s1699_s1 + $0x30] sm:$0xff]  ;;  %v103_v19 = vld [vmem:[%s1699_s1 + $0x48] sm:$0xff] }
 0x14b   :  { %v1143_v58 = vpop.eup %1142  ;;  %v335_v59 = vsel %vm126_vm0, %v1141_v44, 0.0  ;;  %1158 = vrcp.f32 %v255_v63  ;;  %v433_v15 = vsel %vm126_vm0, %v100_v12, 0.0  ;;  %v442_v55 = vsel %vm126_vm0, %v103_v19, 0.0 }
 0x14c   :  { %336 = vadd.xlane.f32.xlu0 %v335_v59  ;;  %v293_v1 = vmul.f32 %v1143_v58, %v1423_v36  ;;  %1160 = vpow2.f32 %v313_v0  ;;  %v494_v13 = vsel %vm126_vm0, %v468_v29, 0.0 }
 0x14d   :  { %1162 = vrcp.f32 %v258_v7  ;;  %v267_v33 = vpop.xlane.xlu0 %266 }
 0x14e   :  { %v1145_v26 = vpop.eup %1144  ;;  %v315_v8 = vmul.f32 1.442695, %v293_v1  ;;  %v469_v31 = vmul.f32 %v293_v1, %v100_v12 }
 0x14f   :  { %v1147_v2 = vpop.eup %1146  ;;  %v338_v3 = vsel %vm126_vm0, %v1145_v26, 0.0 }
 0x150   :  { %339 = vadd.xlane.f32.xlu1 %v338_v3  ;;  %492 = vadd.xlane.f32.xlu0 %v491_v4  ;;  %v1149_v5 = vpop.eup %1148  ;;  %v294_v10 = vmul.f32 %v1147_v2, %v1425_v41  ;;  %1164 = vpow2.f32 %v315_v8  ;;  %v497_v40 = vsel %vm126_vm0, %v469_v31, 0.0 }
 0x151   :  { %v1151_v11 = vpop.eup %1150  ;;  %v341_v36 = vsel %vm126_vm0, %v1149_v5, 0.0  ;;  %1166 = vrcp.f32 %v261_v18 }
 0x152   :  { %v1153_v14 = vpop.eup %1152  ;;  %v1519_v17 = vmul.f32 %v1151_v11, %v1433_v48  ;;  %v317_v41 = vmul.f32 1.442695, %v294_v10  ;;  %v264_v48 = vpop.xlane.xlu1 %263  ;;  %v470_v6 = vmul.f32 %v294_v10, %v101_v23  ;;  %v1248_v10 = vmov 0.0|0.0  }
 0x153   :  { %v1155_v20 = vpop.eup %1154  ;;  %v344_v21 = vsel %vm126_vm0, %v1153_v14, 0.0  ;;  %1024 = vmatprep.subr.bf16.mxu1 %v1248_v10  ;;  %1056 = vmatprep.subr.bf16.mxu0 %v1248_v10 }
 0x154   :  { %495 = vadd.xlane.f32.xlu1 %v494_v13  ;;  %342 = vadd.xlane.f32.xlu0 %v341_v36  ;;  %v1157_v22 = vpop.eup %1156  ;;  %v296_v25 = vmul.f32 %v1155_v20, %v1435_v51  ;;  %1168 = vpow2.f32 %v317_v41  ;;  %v319_v27 = vmul.f32 1.442695, %v1519_v17  ;;  %v500_v16 = vsel %vm126_vm0, %v470_v6, 0.0  ;;  %v104_v13 = vld [vmem:[%s1699_s1 + $0x50] sm:$0xff] }
 0x155   :  { %v1159_v28 = vpop.eup %1158  ;;  %v347_v30 = vsel %vm126_vm0, %v1157_v22, 0.0  ;;  %1170 = vrcp.f32 %v264_v48  ;;  %v471_v26 = vmul.f32 %v1519_v17, %v102_v9 }
 0x156   :  { %v1161_v34 = vpop.eup %1160  ;;  %v1530_v32 = vmul.f32 %v1159_v28, %v1441_v45  ;;  %1172 = vpow2.f32 %v319_v27  ;;  %v321_v35 = vmul.f32 1.442695, %v296_v25  ;;  %v270_v46 = vpop.xlane.xlu1 %269  ;;  %v472_v4 = vmul.f32 %v296_v25, %v103_v19  ;;  %v106_v28 = vld [vmem:[%s1699_s1 + $0x60] sm:$0xff] }
 0x157   :  { %v1163_v37 = vpop.eup %1162  ;;  %v350_v51 = vsel %vm126_vm0, %v1161_v34, 0.0  ;;  %1174 = vrcp.f32 %v267_v33  ;;  %v503_v3 = vsel %vm126_vm0, %v471_v26, 0.0 }
 0x158   :  { %345 = vadd.xlane.f32.xlu1 %v344_v21  ;;  %434 = vadd.xlane.f32.xlu0 %v433_v15  ;;  %v1535_v43 = vmul.f32 %v1163_v37, %v1443_v53  ;;  %1176 = vpow2.f32 %v321_v35  ;;  %v323_v45 = vmul.f32 1.442695, %v1530_v32  ;;  %v439_v53 = vsel %vm126_vm0, %v102_v9, 0.0  ;;  %v105_v15 = vld [vmem:[%s1699_s1 + $0x58] sm:$0xff] }
 0x159   :  { %1178 = vrcp.f32 %v270_v46  ;;  %v448_v17 = vsel %vm126_vm0, %v105_v15, 0.0  ;;  %v473_v41 = vmul.f32 %v1530_v32, %v104_v13  ;;  %v107_v32 = vld [vmem:[%s1699_s1 + $0x68] sm:$0xff] }
 0x15a   :  { %v1165_v42 = vpop.eup %1164  ;;  %1180 = vpow2.f32 %v323_v45  ;;  %v325_v50 = vmul.f32 1.442695, %v1535_v43  ;;  %v474_v23 = vmul.f32 %v1535_v43, %v105_v15  ;;  %v454_v33 = vsel %vm126_vm0, %v107_v32, 0.0  ;;  %v109_v43 = vld [vmem:[%s1699_s1 + $0x78] sm:$0xff]  ;;  %v420_v9 = vpop.xlane.xlu1 %419 }
 0x15b   :  { %v1167_v38 = vpop.eup %1166  ;;  %v353_v39 = vsel %vm126_vm0, %v1165_v42, 0.0  ;;  %v509_v22 = vsel %vm126_vm0, %v473_v41, 0.0  ;;  %v460_v46 = vsel %vm126_vm0, %v109_v43, 0.0 }
 0x15c   :  { %437 = vadd.xlane.f32.xlu1 %v436_v24  ;;  %348 = vadd.xlane.f32.xlu0 %v347_v30  ;;  %v1545_v49 = vmul.f32 %v1167_v38, %v1449_v56  ;;  %1182 = vpow2.f32 %v325_v50  ;;  %v512_v25 = vsel %vm126_vm0, %v474_v23, 0.0  ;;  %v451_v30 = vsel %vm126_vm0, %v106_v28, 0.0 }
 0x15e   :  { %v1169_v47 = vpop.eup %1168  ;;  %v327_v56 = vmul.f32 1.442695, %v1545_v49  ;;  %v475_v34 = vmul.f32 %v1545_v49, %v106_v28  ;;  %v426_v49 = vpop.xlane.xlu1 %425 }
 0x15f   :  { %v1171_v52 = vpop.eup %1170  ;;  %v356_v44 = vsel %vm126_vm0, %v1169_v47, 0.0  ;;  %v417_v47 = vpop.xlane.xlu0 %416 }
 0x160   :  { %351 = vadd.xlane.f32.xlu1 %v350_v51  ;;  %498 = vadd.xlane.f32.xlu0 %v497_v40  ;;  %v1173_v54 = vpop.eup %1172  ;;  %v1554_v58 = vmul.f32 %v1171_v52, %v1451_v57  ;;  %1184 = vpow2.f32 %v327_v56  ;;  %v515_v35 = vsel %vm126_vm0, %v475_v34, 0.0  ;;  %v108_v51 = vld [vmem:[%s1699_s1 + $0x70] sm:$0xff] }
 0x161   :  { %v1175_v59 = vpop.eup %1174  ;;  %v359_v61 = vsel %vm126_vm0, %v1173_v54, 0.0  ;;  %v457_v40 = vsel %vm126_vm0, %v108_v51, 0.0 }
 0x162   :  { %v1177_v63 = vpop.eup %1176  ;;  %v1560_v0 = vmul.f32 %v1175_v59, %v1457_v60  ;;  %v329_v1 = vmul.f32 1.442695, %v1554_v58  ;;  %v506_v60 = vsel %vm126_vm0, %v472_v4, 0.0  ;;  %v476_v37 = vmul.f32 %v1554_v58, %v107_v32  ;;  %v1611_v52 = vpop.xlane.xlu1 %431 }
 0x163   :  { %v1179_v2 = vpop.eup %1178  ;;  %v362_v57 = vsel %vm126_vm0, %v1177_v63, 0.0 }
 0x164   :  { %501 = vadd.xlane.f32.xlu1 %v500_v16  ;;  %354 = vadd.xlane.f32.xlu0 %v353_v39  ;;  %v1181_v29 = vpop.eup %1180  ;;  %v302_v5 = vmul.f32 %v1179_v2, %v1462_v62  ;;  %1186 = vpow2.f32 %v329_v1  ;;  %v331_v7 = vmul.f32 1.442695, %v1560_v0  ;;  %v445_v62 = vsel %vm126_vm0, %v104_v13, 0.0 }
 0x165   :  { %v365_v8 = vsel %vm126_vm0, %v1181_v29, 0.0  ;;  %v518_v6 = vsel %vm126_vm0, %v476_v37, 0.0  ;;  %v477_v42 = vmul.f32 %v1560_v0, %v108_v51  ;;  %v1249_v39 = vmov 0.0  }
 0x166   :  { %v1183_v11 = vpop.eup %1182  ;;  %1188 = vpow2.f32 %v331_v7  ;;  %v333_v36 = vmul.f32 1.442695, %v302_v5  ;;  %v478_v38 = vmul.f32 %v302_v5, %v109_v43  ;;  %77 = vst [vmem:[#allocation2] sm:$0x1] %v1249_v39  ;;  %986 = vmatprep.mubr.msk.f32.mxu1 %vm1250_vm1, %v1249_v39  ;;  %1021 = vmatprep.mubr.msk.f32.mxu0 %vm1250_vm1, %v1249_v39 }
 0x167   :  { %v368_v14 = vsel %vm126_vm0, %v1183_v11, 0.0  ;;  %v521_v45 = vsel %vm126_vm0, %v477_v42, 0.0 }
 0x168   :  { %357 = vadd.xlane.f32.xlu1 %v356_v44  ;;  %440 = vadd.xlane.f32.xlu0 %v439_v53  ;;  %1190 = vpow2.f32 %v333_v36  ;;  %v524_v16 = vsel %vm126_vm0, %v478_v38, 0.0  ;;  %v423_v53 = vpop.xlane.xlu0 %422 }
 0x16a   :  { %v1185_v12 = vpop.eup %1184 }
 0x16b   :  { %v371_v18 = vsel %vm126_vm0, %v1185_v12, 0.0 }
 0x16c   :  { %443 = vadd.xlane.f32.xlu1 %v442_v55  ;;  %360 = vadd.xlane.f32.xlu0 %v359_v61  ;;  %v429_v50 = vpop.xlane.xlu0 %428 }
 0x16e   :  { %v1187_v20 = vpop.eup %1186 }
 0x16f   :  { %v374_v21 = vsel %vm126_vm0, %v1187_v20, 0.0 }
 0x170   :  { %363 = vadd.xlane.f32.xlu1 %v362_v57  ;;  %504 = vadd.xlane.f32.xlu0 %v503_v3  ;;  %v1189_v24 = vpop.eup %1188 }
 0x171   :  { %v377_v48 = vsel %vm126_vm0, %v1189_v24, 0.0 }
 0x172   :  { %v1191_v27 = vpop.eup %1190 }
 0x173   :  { %v380_v31 = vsel %vm126_vm0, %v1191_v27, 0.0 }
 0x174   :  { %507 = vadd.xlane.f32.xlu1 %v506_v60  ;;  %366 = vadd.xlane.f32.xlu0 %v365_v8 }
 0x178   :  { %369 = vadd.xlane.f32.xlu1 %v368_v14  ;;  %446 = vadd.xlane.f32.xlu0 %v445_v62 }
 0x17c   :  { %449 = vadd.xlane.f32.xlu1 %v448_v17  ;;  %372 = vadd.xlane.f32.xlu0 %v371_v18 }
 0x180   :  { %375 = vadd.xlane.f32.xlu1 %v374_v21  ;;  %510 = vadd.xlane.f32.xlu0 %v509_v22 }
 0x184   :  { %513 = vadd.xlane.f32.xlu1 %v512_v25  ;;  %378 = vadd.xlane.f32.xlu0 %v377_v48 }
 0x188   :  { %381 = vadd.xlane.f32.xlu1 %v380_v31  ;;  %452 = vadd.xlane.f32.xlu0 %v451_v30 }
 0x18c   :  { %455 = vadd.xlane.f32.xlu1 %v454_v33  ;;  %516 = vadd.xlane.f32.xlu0 %v515_v35 }
 0x190   :  { %519 = vadd.xlane.f32.xlu1 %v518_v6  ;;  %458 = vadd.xlane.f32.xlu0 %v457_v40 }
 0x194   :  { %461 = vadd.xlane.f32.xlu1 %v460_v46  ;;  %522 = vadd.xlane.f32.xlu0 %v521_v45 }
 0x198   :  { %525 = vadd.xlane.f32.xlu1 %v524_v16 }
 0x1ce   :  { %v481_v44 = vpop.xlane.xlu0 %480 }
 0x1d2   :  { %v484_v54 = vpop.xlane.xlu1 %483 }
 0x1d3   :  { %v487_v19 = vpop.xlane.xlu0 %486 }
 0x1d6   :  { %v490_v55 = vpop.xlane.xlu1 %489 }
 0x1d9   :  { %v337_v58 = vpop.xlane.xlu0 %336 }
 0x1da   :  { %1192 = vlog2.f32 %v337_v58 }
 0x1dd   :  { %v340_v56 = vpop.xlane.xlu1 %339  ;;  %v1613_v59 = vpop.xlane.xlu0 %492 }
 0x1de   :  { %1194 = vlog2.f32 %v340_v56 }
 0x1e1   :  { %v1615_v61 = vpop.xlane.xlu1 %495  ;;  %v343_v26 = vpop.xlane.xlu0 %342 }
 0x1e2   :  { %1196 = vlog2.f32 %v343_v26 }
 0x1e4   :  { %v1193_v63 = vpop.eup %1192 }
 0x1e5   :  { %v384_v0 = vmul.f32 0.6931472, %v1193_v63  ;;  %v346_v1 = vpop.xlane.xlu1 %345  ;;  %v1617_v2 = vpop.xlane.xlu0 %434 }
 0x1e6   :  { %1198 = vlog2.f32 %v346_v1 }
 0x1e7   :  { %v527_v3 = vmul.f32 %v417_v47, %v384_v0 }
 0x1e8   :  { %v1195_v57 = vpop.eup %1194 }
 0x1e9   :  { %v386_v4 = vmul.f32 0.6931472, %v1195_v57  ;;  %v1619_v29 = vpop.xlane.xlu1 %437  ;;  %v349_v5 = vpop.xlane.xlu0 %348  ;;  %v543_v62 = vsub.f32 %v527_v3, %v481_v44 }
 0x1ea   :  { %1200 = vlog2.f32 %v349_v5 }
 0x1eb   :  { %v528_v7 = vmul.f32 %v420_v9, %v386_v4 }
 0x1ec   :  { %v1197_v60 = vpop.eup %1196 }
 0x1ed   :  { %v388_v8 = vmul.f32 0.6931472, %v1197_v60  ;;  %v352_v11 = vpop.xlane.xlu1 %351  ;;  %v1621_v13 = vpop.xlane.xlu0 %498  ;;  %v544_v36 = vsub.f32 %v528_v7, %v484_v54 }
 0x1ee   :  { %1202 = vlog2.f32 %v352_v11 }
 0x1ef   :  { %v559_v12 = vpack.c.bf16 %v544_v36, %v543_v62  ;;  %v529_v17 = vmul.f32 %v423_v53, %v388_v8 }
 0x1f0   :  { %v1199_v15 = vpop.eup %1198 }
 0x1f1   :  { %v390_v18 = vmul.f32 0.6931472, %v1199_v15  ;;  %v502_v41 = vpop.xlane.xlu1 %501  ;;  %1027 = vmatpush3.bf16.xpose.msk.msra.mxu1 %vm1625_vm3, %v559_v12  ;;  %v355_v20 = vpop.xlane.xlu0 %354  ;;  %v567_v21 = vunpack.c.l.bf16 %v559_v12  ;;  %v568_v22 = vunpack.c.h.bf16 %v559_v12  ;;  %v545_v27 = vsub.f32 %v529_v17, %v487_v19 }
 0x1f2   :  { %1204 = vlog2.f32 %v355_v20  ;;  %1028 = vmatprep.subr.bf16.mxu1 %v1248_v10 }
 0x1f3   :  { %v530_v23 = vmul.f32 %v426_v49, %v390_v18  ;;  %v583_v24 = vsub.f32 %v543_v62, %v567_v21  ;;  %v584_v25 = vsub.f32 %v544_v36, %v568_v22 }
 0x1f4   :  { %v1201_v48 = vpop.eup %1200 }
 0x1f5   :  { %v546_v28 = vsub.f32 %v530_v23, %v490_v55  ;;  %v392_v30 = vmul.f32 0.6931472, %v1201_v48  ;;  %v358_v31 = vpop.xlane.xlu1 %357  ;;  %v441_v34 = vpop.xlane.xlu0 %440  ;;  %v1057_v32 = vpack.c.bf16 %v584_v25, %v583_v24 }
 0x1f6   :  { %1206 = vlog2.f32 %v358_v31 }
 0x1f7   :  { %1059 = vmatpush3.bf16.xpose.msk.msra.mxu0 %vm1625_vm3, %v1057_v32  ;;  %v560_v33 = vpack.c.bf16 %v546_v28, %v545_v27  ;;  %v531_v37 = vmul.f32 %v429_v50, %v392_v30 }
 0x1f8   :  { %v1203_v35 = vpop.eup %1202  ;;  %1060 = vmatprep.subr.bf16.mxu0 %v1248_v10 }
 0x1f9   :  { %v394_v51 = vmul.f32 0.6931472, %v1203_v35  ;;  %v444_v40 = vpop.xlane.xlu1 %443  ;;  %1031 = vmatpush3.bf16.xpose.msk.msra.mxu1 %vm1625_vm3, %v560_v33  ;;  %v361_v6 = vpop.xlane.xlu0 %360  ;;  %v569_v42 = vunpack.c.l.bf16 %v560_v33  ;;  %v570_v43 = vunpack.c.h.bf16 %v560_v33  ;;  %v547_v39 = vsub.f32 %v531_v37, %v1613_v59 }
 0x1fa   :  { %1208 = vlog2.f32 %v361_v6  ;;  %1032 = vmatprep.subr.bf16.mxu1 %v1248_v10 }
 0x1fb   :  { %v532_v46 = vmul.f32 %v1611_v52, %v394_v51  ;;  %v585_v45 = vsub.f32 %v545_v27, %v569_v42  ;;  %v586_v38 = vsub.f32 %v546_v28, %v570_v43 }
 0x1fc   :  { %v1205_v16 = vpop.eup %1204 }
 0x1fd   :  { %v548_v47 = vsub.f32 %v532_v46, %v1615_v61  ;;  %v396_v9 = vmul.f32 0.6931472, %v1205_v16  ;;  %v364_v53 = vpop.xlane.xlu1 %363  ;;  %v505_v49 = vpop.xlane.xlu0 %504  ;;  %v1061_v50 = vpack.c.bf16 %v586_v38, %v585_v45 }
 0x1fe   :  { %1210 = vlog2.f32 %v364_v53 }
 0x1ff   :  { %1063 = vmatpush3.bf16.xpose.msk.msra.mxu0 %vm1625_vm3, %v1061_v50  ;;  %v561_v44 = vpack.c.bf16 %v548_v47, %v547_v39  ;;  %v533_v52 = vmul.f32 %v1617_v2, %v396_v9 }
 0x200   :  { %v1207_v54 = vpop.eup %1206  ;;  %1064 = vmatprep.subr.bf16.mxu0 %v1248_v10 }
 0x201   :  { %v398_v19 = vmul.f32 0.6931472, %v1207_v54  ;;  %v508_v55 = vpop.xlane.xlu1 %507  ;;  %1035 = vmatpush3.bf16.xpose.msk.msra.mxu1 %vm1625_vm3, %v561_v44  ;;  %v367_v58 = vpop.xlane.xlu0 %366  ;;  %v571_v56 = vunpack.c.l.bf16 %v561_v44  ;;  %v572_v59 = vunpack.c.h.bf16 %v561_v44  ;;  %v549_v1 = vsub.f32 %v533_v52, %v1621_v13 }
 0x202   :  { %1212 = vlog2.f32 %v367_v58  ;;  %1036 = vmatprep.subr.bf16.mxu1 %v1248_v10 }
 0x203   :  { %v534_v61 = vmul.f32 %v1619_v29, %v398_v19  ;;  %v587_v26 = vsub.f32 %v547_v39, %v571_v56  ;;  %v588_v63 = vsub.f32 %v548_v47, %v572_v59 }
 0x204   :  { %v1209_v0 = vpop.eup %1208 }
 0x205   :  { %v550_v57 = vsub.f32 %v534_v61, %v502_v41  ;;  %v400_v2 = vmul.f32 0.6931472, %v1209_v0  ;;  %v370_v3 = vpop.xlane.xlu1 %369  ;;  %v447_v4 = vpop.xlane.xlu0 %446  ;;  %v1065_v5 = vpack.c.bf16 %v588_v63, %v587_v26 }
 0x206   :  { %1214 = vlog2.f32 %v370_v3 }
 0x207   :  { %1067 = vmatpush3.bf16.xpose.msk.msra.mxu0 %vm1625_vm3, %v1065_v5  ;;  %v562_v7 = vpack.c.bf16 %v550_v57, %v549_v1  ;;  %v535_v29 = vmul.f32 %v441_v34, %v400_v2 }
 0x208   :  { %v1211_v60 = vpop.eup %1210  ;;  %1068 = vmatprep.subr.bf16.mxu0 %v1248_v10 }
 0x209   :  { %v402_v8 = vmul.f32 0.6931472, %v1211_v60  ;;  %v450_v11 = vpop.xlane.xlu1 %449  ;;  %1039 = vmatpush3.bf16.xpose.msk.msra.mxu1 %vm1625_vm3, %v562_v7  ;;  %v373_v13 = vpop.xlane.xlu0 %372  ;;  %v573_v62 = vunpack.c.l.bf16 %v562_v7  ;;  %v574_v36 = vunpack.c.h.bf16 %v562_v7  ;;  %v551_v41 = vsub.f32 %v535_v29, %v505_v49 }
 0x20a   :  { %1216 = vlog2.f32 %v373_v13  ;;  %1040 = vmatprep.subr.bf16.mxu1 %v1248_v10 }
 0x20b   :  { %v536_v12 = vmul.f32 %v444_v40, %v402_v8  ;;  %v589_v15 = vsub.f32 %v549_v1, %v573_v62  ;;  %v590_v17 = vsub.f32 %v550_v57, %v574_v36 }
 0x20c   :  { %v1213_v18 = vpop.eup %1212 }
 0x20d   :  { %v552_v20 = vsub.f32 %v536_v12, %v508_v55  ;;  %v404_v21 = vmul.f32 0.6931472, %v1213_v18  ;;  %v376_v22 = vpop.xlane.xlu1 %375  ;;  %v511_v23 = vpop.xlane.xlu0 %510  ;;  %v1069_v24 = vpack.c.bf16 %v590_v17, %v589_v15 }
 0x20e   :  { %1218 = vlog2.f32 %v376_v22 }
 0x20f   :  { %v563_v25 = vpack.c.bf16 %v552_v20, %v551_v41  ;;  %1071 = vmatpush3.bf16.xpose.msk.msra.mxu0 %vm1625_vm3, %v1069_v24  ;;  %v537_v30 = vmul.f32 %v447_v4, %v404_v21 }
 0x210   :  { %v1215_v48 = vpop.eup %1214  ;;  %1072 = vmatprep.subr.bf16.mxu0 %v1248_v10 }
 0x211   :  { %v575_v27 = vunpack.c.l.bf16 %v563_v25  ;;  %v576_v28 = vunpack.c.h.bf16 %v563_v25  ;;  %v406_v31 = vmul.f32 0.6931472, %v1215_v48  ;;  %v514_v34 = vpop.xlane.xlu1 %513  ;;  %1043 = vmatpush3.bf16.xpose.msk.msra.mxu1 %vm1625_vm3, %v563_v25  ;;  %v379_v32 = vpop.xlane.xlu0 %378  ;;  %v553_v6 = vsub.f32 %v537_v30, %v511_v23 }
 0x212   :  { %1220 = vlog2.f32 %v379_v32  ;;  %1044 = vmatprep.subr.bf16.mxu1 %v1248_v10 }
 0x213   :  { %v591_v33 = vsub.f32 %v551_v41, %v575_v27  ;;  %v592_v35 = vsub.f32 %v552_v20, %v576_v28  ;;  %v538_v37 = vmul.f32 %v450_v11, %v406_v31  ;;  %v1251_v20 = vmov 1.0  }
 0x214   :  { %v1217_v51 = vpop.eup %1216 }
 0x215   :  { %v1073_v40 = vpack.c.bf16 %v592_v35, %v591_v33  ;;  %v554_v42 = vsub.f32 %v538_v37, %v514_v34  ;;  %v382_v43 = vpop.xlane.xlu1 %381  ;;  %v453_v46 = vpop.xlane.xlu0 %452  ;;  %v408_v45 = vmul.f32 0.6931472, %v1217_v51  ;;  %v842_v35 = vld [vmem:[#allocation2] sm:$0x1] }
 0x216   :  { %1222 = vlog2.f32 %v382_v43 }
 0x217   :  { %v564_v38 = vpack.c.bf16 %v554_v42, %v553_v6  ;;  %1075 = vmatpush3.bf16.xpose.msk.msra.mxu0 %vm1625_vm3, %v1073_v40  ;;  %v539_v50 = vmul.f32 %v453_v46, %v408_v45 }
 0x218   :  { %v1219_v16 = vpop.eup %1218  ;;  %1076 = vmatprep.subr.bf16.mxu0 %v1248_v10 }
 0x219   :  { %v577_v39 = vunpack.c.l.bf16 %v564_v38  ;;  %v578_v47 = vunpack.c.h.bf16 %v564_v38  ;;  %v410_v9 = vmul.f32 0.6931472, %v1219_v16  ;;  %v456_v53 = vpop.xlane.xlu1 %455  ;;  %1047 = vmatpush3.bf16.xpose.msk.msra.mxu1 %vm1625_vm3, %v564_v38  ;;  %v517_v49 = vpop.xlane.xlu0 %516 }
 0x21a   :  { %1048 = vmatprep.subr.bf16.mxu1 %v1248_v10  ;;  %v555_v59 = vsub.f32 %v539_v50, %v517_v49 }
 0x21b   :  { %v593_v44 = vsub.f32 %v553_v6, %v577_v39  ;;  %v594_v54 = vsub.f32 %v554_v42, %v578_v47  ;;  %v540_v52 = vmul.f32 %v456_v53, %v410_v9 }
 0x21c   :  { %v1221_v19 = vpop.eup %1220 }
 0x21d   :  { %v1077_v55 = vpack.c.bf16 %v594_v54, %v593_v44  ;;  %v520_v58 = vpop.xlane.xlu1 %519  ;;  %v459_v56 = vpop.xlane.xlu0 %458  ;;  %v412_v26 = vmul.f32 0.6931472, %v1221_v19 }
 0x21e   :  { %v556_v61 = vsub.f32 %v540_v52, %v520_v58 }
 0x21f   :  { %1079 = vmatpush3.bf16.xpose.msk.msra.mxu0 %vm1625_vm3, %v1077_v55  ;;  %v541_v4 = vmul.f32 %v459_v56, %v412_v26 }
 0x220   :  { %v1223_v63 = vpop.eup %1222  ;;  %v565_v0 = vpack.c.bf16 %v556_v61, %v555_v59  ;;  %1080 = vmatprep.subr.bf16.mxu0 %v1248_v10 }
 0x221   :  { %v414_v1 = vmul.f32 0.6931472, %v1223_v63  ;;  %v462_v57 = vpop.xlane.xlu1 %461  ;;  %v523_v7 = vpop.xlane.xlu0 %522 }
 0x222   :  { %v579_v2 = vunpack.c.l.bf16 %v565_v0  ;;  %v580_v3 = vunpack.c.h.bf16 %v565_v0  ;;  %1051 = vmatpush3.bf16.xpose.msk.msra.mxu1 %vm1625_vm3, %v565_v0  ;;  %v557_v13 = vsub.f32 %v541_v4, %v523_v7 }
 0x223   :  { %v542_v5 = vmul.f32 %v462_v57, %v414_v1  ;;  %1052 = vmatprep.subr.bf16.mxu1 %v1248_v10 }
 0x224   :  { %v595_v60 = vsub.f32 %v555_v59, %v579_v2  ;;  %v596_v8 = vsub.f32 %v556_v61, %v580_v3 }
 0x225   :  { %v526_v29 = vpop.xlane.xlu1 %525 }
 0x226   :  { %v1081_v11 = vpack.c.bf16 %v596_v8, %v595_v60  ;;  %v558_v62 = vsub.f32 %v542_v5, %v526_v29 }
 0x228   :  { %v566_v36 = vpack.c.bf16 %v558_v62, %v557_v13  ;;  %1083 = vmatpush3.bf16.xpose.msk.msra.mxu0 %vm1625_vm3, %v1081_v11 }
 0x229   :  { %1084 = vmatprep.subr.bf16.mxu0 %v1248_v10  ;;  %v840_v10 = vld [vmem:[%s1700_s2] sm:$0x1]  ;;  %s1224_s2 = scalar_lea.vmem %s864_s22, 16 }
 0x22a   :  { %v581_v12 = vunpack.c.l.bf16 %v566_v36  ;;  %v582_v15 = vunpack.c.h.bf16 %v566_v36  ;;  %1055 = vmatpush3.bf16.xpose.msk.msra.mxu1 %vm1625_vm3, %v566_v36  ;;  %p1225_p0 = scmp.ne.s32.totalorder %s864_s22, %s1224_s2  ;;  %p1230_p2 = scmp.lt.s32.totalorder %s1228_s24, %s1224_s2 }
 0x22c   :  { %v597_v17 = vsub.f32 %v557_v13, %v581_v12  ;;  %v598_v18 = vsub.f32 %v558_v62, %v582_v15  ;;  %p1231_p3 = por %p1230_p2, %p1229_p1 }
 0x22e   :  { %v1085_v41 = vpack.c.bf16 %v598_v18, %v597_v17  ;;  %p1232_p4 = pnand %p1231_p3, %p1225_p0 }
 0x230   :  { %1087 = vmatpush3.bf16.xpose.msk.msra.mxu0 %vm1625_vm3, %v1085_v41 }
 0x231   :  { %987 = vmatmul.mubr.msk.f32.vlgmr.msra.gmra.mrb[0].mxu1 %vm599_vm2, %v1251_v20 }
 0x237   :  { %1022 = vmatmul.mubr.msk.f32.vlgmr.msra.gmra.mrb[0].mxu0 %vm599_vm2, %v1251_v20 }
 0x304   :  { %v717_v21 = vpop.f32.mrb[0].mxu1 }
 0x305   :  { %v988_v22 = vpop.f32.mrb[1].mxu1 }
 0x30a   :  { %v835_v23 = vpop.f32.mrb[0].mxu0 }
 0x30b   :  { %v839_v24 = vadd.f32 %v835_v23, %v717_v21  ;;  %v1023_v25 = vpop.f32.mrb[1].mxu0 }
 0x30d   :  { %v841_v48 = vmul.f32 %v840_v10, %v839_v24 }
 0x30f   :  { %v844_v27 = vsel %vm843_vm4, %v841_v48, 0.0 }
 0x310   :  { %845 = vadd.xlane.f32.xlu0 %v844_v27 }
 0x39d   :  { %v846_v14 = vpop.xlane.xlu0 %845 }
 0x39e   :  { %v847_v28 = vrot.slane %v846_v14, 4 }
 0x3a0   :  { %v848_v30 = vadd.f32 %v847_v28, %v846_v14 }
 0x3a2   :  { %v849_v31 = vrot.slane %v848_v30, 2 }
 0x3a4   :  { %v850_v34 = vadd.f32 %v849_v31, %v848_v30 }
 0x3a6   :  { %v851_v32 = vrot.slane %v850_v34, 1 }
 0x3a8   :  { %v852_v33 = vadd.f32 %v851_v32, %v850_v34 }
 0x3aa   :  { %1089 = vpush %v852_v33 }
 0x3db   :  { %s1090_s23 = spop %1089 }
 0x3dc   :  { %v854_v37 = vstv %s1090_s23 }
 0x3dd   :  { %v855_v51 = vadd.f32 %v854_v37, %v842_v35 }
 0x3df   :  { %856 = vst [vmem:[#allocation2] sm:$0x1] %v855_v51 }
 0x3e0   :  { %1235 = shalt.err (!%p1232_p4)
}
 0x3e1   :  { %s1236_s27 = scalar_lea.hbm %s1701_s3, 16 }
 0x3e2   :  { %p1237_p5 = scmp.ne.s32.totalorder %s1701_s3, %s1236_s27  ;;  %p1240_p6 = scmp.lt.u32.totalorder %s1236_s27, %s1701_s3 }
 0x3e4   :  { %p1242_p7 = pnand %p1240_p6, %p1237_p5 }
 0x3e6   :  { %1245 = shalt.err (!%p1242_p7)
}
 0x3e7   :  { %866 = dma.vmem_to_hbm [thread:$0]  %s864_s22, 16, %s1701_s3, [#allocation3]  }
 0x3e8   :  { %1246 = dma.done.wait [#allocation3], 16  }
 0x3e9   :  { %1247 = vsyncadd [#allocation3], 4294967280 }
 0x3ea   :  { %870 = vsyncpa [#allocation3], 1 }

</bundles_post_ra>
